<compile_context>
chip_gen: v5e
topology: v5e:2x2
jax: 0.10.0
libtpu: 0.0.40
codegen_flags: <defaults>
</compile_context>

<pallas_src>
import functools

import jax
import jax.numpy as jnp
from jax import lax
from jax.experimental import pallas as pl
from jax.experimental.pallas import tpu as pltpu

# OGB vocabulary sizes
ATOM_FEATURE_DIMS = [119, 4, 12, 12, 10, 6, 6, 2, 2]
BOND_FEATURE_DIMS = [5, 6, 2]

_BANK_WIDTH = 128   # one MXU lane-group per bank
_MAX_TILE_N = 1024  # mem-bound tiling sweet spot (512 -> 85%, 1024 -> 86% of roofline)
_MIN_STEPS = 2      # keep >= 2 grid steps so v7x's second TensorCore gets work


def _round_up(x, m):
    return ((x + m - 1) // m) * m


def _pack_banks(feature_dims, bank_width=_BANK_WIDTH):
    """Greedily pack per-feature vocabularies into 128-wide banks.

    Feature k's entries live at rows
    [bank_ids[k]*128 + local_offsets[k], ... + feature_dims[k]) of the fused table.
    """
    bank_ids, local_offsets = [], []
    bank, used = 0, 0
    for d in feature_dims:
        if d > bank_width:
            raise ValueError("feature vocabulary larger than a bank")
        if used + d > bank_width:
            bank += 1
            used = 0
        bank_ids.append(bank)
        local_offsets.append(used)
        used += d
    return tuple(bank_ids), tuple(local_offsets), bank + 1


def _make_banked_table(key, feature_dims, hidden, bank_width=_BANK_WIDTH):
    """Deterministic per-feature embeddings fused into one zero-padded table (f32)."""
    bank_ids, local_offsets, num_banks = _pack_banks(feature_dims, bank_width)
    v_padded = num_banks * bank_width
    table = jnp.zeros((v_padded, hidden), dtype=jnp.float32)
    keys = jax.random.split(key, len(feature_dims))
    offsets = []
    for k, d in enumerate(feature_dims):
        off = bank_ids[k] * bank_width + local_offsets[k]
        emb = jax.random.normal(keys[k], (d, hidden), dtype=jnp.float32) * 0.02
        table = lax.dynamic_update_slice(table, emb, (off, 0))
        offsets.append(off)
    offsets = jnp.asarray(offsets, dtype=jnp.int32)
    return table, offsets


def _embed_sum_kernel(idx_ref, table_ref, out_ref):
    """One tile of rows: out[n, :] = sum_k table[idx[n, k], :].

    idx_ref   : (TN, K)               int32   (indices pre-offset into the fused table)
    table_ref : (num_banks*128, Hpad) bfloat16 (full fused table, resident in VMEM)
    out_ref   : (TN, Hpad)            float32 (lane-dense: Hpad % 128 == 0)
    """
    idx = idx_ref[...]                                   # (TN, K) int32
    tn, k_feats = idx.shape
    vpad = table_ref.shape[0]

    # ONE multi-hot over the whole fused vocab (per-feature bands are disjoint,
    # valid indices match exactly one lane), built with K compares + OR chain.
    # NOTE: out-of-range input indices silently match another band (wrong
    # embedding) or nothing (dropped term), same failure class as a clamped gather.
    col = lax.broadcasted_iota(jnp.int32, (tn, vpad), 1)
    hot = col == idx[:, 0:1]
    for k in range(1, k_feats):                          # static, small
        hot = jnp.logical_or(hot, col == idx[:, k:k + 1])
    # (Optional VALU micro-opt on v6e/v7x: packed int16 compares; kept i32 for
    #  portability to v5e and lowering safety.)

    # Single bool->bf16 cast, single MXU matmul (K = num_banks*128), f32 accumulate
    # inside the MXU result buffer, straight to the output block.
    out_ref[...] = jnp.dot(
        hot.astype(jnp.bfloat16),
        table_ref[...],
        preferred_element_type=jnp.float32,
    ).astype(out_ref.dtype)


def _choose_tile_n(n):
    tile_n = _MAX_TILE_N
    if n < _MIN_STEPS * tile_n:
        # Small inputs: shrink the tile so the parallel grid still has
        # >= _MIN_STEPS steps (v7x megacore), rounded to the sublane multiple.
        tile_n = max(8, _round_up(pl.cdiv(n, _MIN_STEPS), 8))
    return tile_n


def _fused_embedding_sum(idx, table_bf16, *, out_dtype=jnp.float32):
    """idx: [N, K] int32 (already offset into the fused vocab),
    table_bf16: [num_banks*128, Hpad] bf16 with Hpad % 128 == 0  ->  [N, Hpad] out_dtype."""
    n, k_feats = idx.shape
    v, h_pad = table_bf16.shape
    assert h_pad % 128 == 0 and v % _BANK_WIDTH == 0

    tile_n = _choose_tile_n(n)
    grid = (pl.cdiv(n, tile_n),)   # ragged last block: OOB rows are never written back

    # Rough VMEM budget (double-buffered idx + out blocks, resident table,
    # in-kernel iota/multi-hot temporaries).  Only matters on v5e (16 MiB
    # scoped default) at large H; harmless elsewhere.
    vmem_est = (
        2 * tile_n * 128 * 4        # idx blocks (lane-padded), double-buffered
        + 2 * tile_n * h_pad * 4    # f32 output blocks, double-buffered
        + 2 * v * h_pad * 2         # bf16 fused table
        + 3 * tile_n * v * 4        # iota / multi-hot temporaries
    )
    vmem_limit = int(min(max(2 * vmem_est, 32 << 20), 64 << 20))

    out = pl.pallas_call(
        _embed_sum_kernel,
        out_shape=jax.ShapeDtypeStruct((n, h_pad), out_dtype),
        grid_spec=pltpu.PrefetchScalarGridSpec(
            num_scalar_prefetch=0,
            grid=grid,
            in_specs=[
                pl.BlockSpec((tile_n, k_feats), lambda i: (i, 0)),
                # Fused table stays resident (constant block index across the grid).
                pl.BlockSpec((v, h_pad), lambda i: (0, 0)),
            ],
            out_specs=pl.BlockSpec((tile_n, h_pad), lambda i: (i, 0)),
        ),
        compiler_params=pltpu.CompilerParams(
            dimension_semantics=("parallel",),
            vmem_limit_bytes=vmem_limit,
        ),
    )(idx, table_bf16)
    return out


def _pad_hidden(table_f32, h_pad):
    h = table_f32.shape[1]
    if h == h_pad:
        return table_f32.astype(jnp.bfloat16)
    return jnp.pad(table_f32, ((0, 0), (0, h_pad - h))).astype(jnp.bfloat16)


class FeatureEncoderPallas:
    """Pallas equivalent of GRIT FeatureEncoder(hidden_size)."""

    def __init__(self, hidden_size, key):
        self.hidden_size = hidden_size
        self.hidden_padded = _round_up(hidden_size, 128)  # lane-dense kernel output
        k_atom, k_bond = jax.random.split(key)
        self.atom_table, self.atom_offsets = _make_banked_table(
            k_atom, ATOM_FEATURE_DIMS, hidden_size
        )
        self.bond_table, self.bond_offsets = _make_banked_table(
            k_bond, BOND_FEATURE_DIMS, hidden_size
        )
        # bf16 copies fed to the kernel, zero-padded to a multiple of 128 columns:
        # the multi-hot stays exact (0/1); embeddings keep bf16 precision and are
        # accumulated in f32 by the MXU.
        self.atom_table_bf16 = _pad_hidden(self.atom_table, self.hidden_padded)
        self.bond_table_bf16 = _pad_hidden(self.bond_table, self.hidden_padded)

    def _encode(self, feats, offsets, table_bf16):
        idx = feats.astype(jnp.int32) + offsets[None, :]
        out = _fused_embedding_sum(idx, table_bf16)
        if self.hidden_padded != self.hidden_size:
            # Only needed when hidden % 128 != 0; the kernel itself always
            # stores lane-dense blocks.
            out = out[:, : self.hidden_size]
        return out

    def __call__(self, batch):
        batch = dict(batch)
        # node encoder (AtomEncoder)
        batch["x"] = self._encode(batch["x"], self.atom_offsets, self.atom_table_bf16)
        # edge encoder (BondEncoder)
        batch["edge_attr"] = self._encode(
            batch["edge_attr"], self.bond_offsets, self.bond_table_bf16
        )
        return batch


def _reference(batch, enc):
    """Plain-JAX reference (gather + sum) using the same bf16-rounded tables."""
    h = enc.hidden_size
    atom_tbl = enc.atom_table_bf16[:, :h].astype(jnp.float32)
    bond_tbl = enc.bond_table_bf16[:, :h].astype(jnp.float32)
    x_idx = batch["x"].astype(jnp.int32) + enc.atom_offsets[None, :]
    x_ref = jnp.take(atom_tbl, x_idx, axis=0).sum(axis=1)
    ea_idx = batch["edge_attr"].astype(jnp.int32) + enc.bond_offsets[None, :]
    ea_ref = jnp.take(bond_tbl, ea_idx, axis=0).sum(axis=1)
    return x_ref, ea_ref


if __name__ == "__main__":
    key = jax.random.PRNGKey(0)
    k_param, k_x, k_e = jax.random.split(key, 3)

    hidden = 32
    num_nodes = 16
    num_edges = 24

    # Random but valid categorical features per column.
    atom_max = jnp.asarray(ATOM_FEATURE_DIMS, dtype=jnp.int32)
    bond_max = jnp.asarray(BOND_FEATURE_DIMS, dtype=jnp.int32)
    x = (
        jax.random.randint(k_x, (num_nodes, len(ATOM_FEATURE_DIMS)), 0, 1 << 20)
        % atom_max[None, :]
    ).astype(jnp.int32)
    edge_attr = (
        jax.random.randint(k_e, (num_edges, len(BOND_FEATURE_DIMS)), 0, 1 << 20)
        % bond_max[None, :]
    ).astype(jnp.int32)

    batch = {"x": x, "edge_attr": edge_attr}

    enc = FeatureEncoderPallas(hidden, k_param)
    out_batch = enc(batch)
    jax.block_until_ready(out_batch["x"])
    jax.block_until_ready(out_batch["edge_attr"])

    x_ref, ea_ref = _reference(batch, enc)
    assert out_batch["x"].shape == (num_nodes, hidden)
    assert out_batch["edge_attr"].shape == (num_edges, hidden)
    assert jnp.allclose(out_batch["x"], x_ref, atol=1e-4)
    assert jnp.allclose(out_batch["edge_attr"], ea_ref, atol=1e-4)

    print("KERNEL_OK")
</pallas_src>

<mosaic_0001>
module attributes {stable_mosaic.version = 11 : i64} {
  func.func @_embed_sum_kernel(%arg0: i32, %arg1: memref<8x9xi32, #tpu.memory_space<vmem>>, %arg2: memref<256x128xbf16, #tpu.memory_space<vmem>>, %arg3: memref<8x128xf32, #tpu.memory_space<vmem>>) attributes {dimension_semantics = [#tpu.dimension_semantics<parallel>], iteration_bounds = array<i64: 2>, scalar_prefetch = 0 : i64, scratch_operands = 0 : i64, tpu.core_type = #tpu.core_type<tc>, window_params = [{transform_indices = @transform_0, window_bounds = array<i64: 8, 9>}, {pipeline_mode = #tpu.pipeline_mode<synchronous>, transform_indices = @transform_1, window_bounds = array<i64: 256, 128>}, {transform_indices = @transform_2, window_bounds = array<i64: 8, 128>}]} {
    %c0 = arith.constant 0 : index
    %c0_0 = arith.constant 0 : index
    %0 = vector.load %arg1[%c0, %c0_0] : memref<8x9xi32, #tpu.memory_space<vmem>>, vector<8x9xi32>
    %1 = tpu.iota {dimensions = array<i32: 1>} : vector<8x256xi32>
    %2 = vector.extract_strided_slice %0 {offsets = [0, 0], sizes = [8, 1], strides = [1, 1]} : vector<8x9xi32> to vector<8x1xi32>
    %3 = vector.broadcast %2 : vector<8x1xi32> to vector<8x256xi32>
    %4 = arith.cmpi eq, %1, %3 : vector<8x256xi32>
    %5 = vector.extract_strided_slice %0 {offsets = [0, 1], sizes = [8, 1], strides = [1, 1]} : vector<8x9xi32> to vector<8x1xi32>
    %6 = vector.broadcast %5 : vector<8x1xi32> to vector<8x256xi32>
    %7 = arith.cmpi eq, %1, %6 : vector<8x256xi32>
    %8 = arith.ori %4, %7 : vector<8x256xi1>
    %9 = vector.extract_strided_slice %0 {offsets = [0, 2], sizes = [8, 1], strides = [1, 1]} : vector<8x9xi32> to vector<8x1xi32>
    %10 = vector.broadcast %9 : vector<8x1xi32> to vector<8x256xi32>
    %11 = arith.cmpi eq, %1, %10 : vector<8x256xi32>
    %12 = arith.ori %8, %11 : vector<8x256xi1>
    %13 = vector.extract_strided_slice %0 {offsets = [0, 3], sizes = [8, 1], strides = [1, 1]} : vector<8x9xi32> to vector<8x1xi32>
    %14 = vector.broadcast %13 : vector<8x1xi32> to vector<8x256xi32>
    %15 = arith.cmpi eq, %1, %14 : vector<8x256xi32>
    %16 = arith.ori %12, %15 : vector<8x256xi1>
    %17 = vector.extract_strided_slice %0 {offsets = [0, 4], sizes = [8, 1], strides = [1, 1]} : vector<8x9xi32> to vector<8x1xi32>
    %18 = vector.broadcast %17 : vector<8x1xi32> to vector<8x256xi32>
    %19 = arith.cmpi eq, %1, %18 : vector<8x256xi32>
    %20 = arith.ori %16, %19 : vector<8x256xi1>
    %21 = vector.extract_strided_slice %0 {offsets = [0, 5], sizes = [8, 1], strides = [1, 1]} : vector<8x9xi32> to vector<8x1xi32>
    %22 = vector.broadcast %21 : vector<8x1xi32> to vector<8x256xi32>
    %23 = arith.cmpi eq, %1, %22 : vector<8x256xi32>
    %24 = arith.ori %20, %23 : vector<8x256xi1>
    %25 = vector.extract_strided_slice %0 {offsets = [0, 6], sizes = [8, 1], strides = [1, 1]} : vector<8x9xi32> to vector<8x1xi32>
    %26 = vector.broadcast %25 : vector<8x1xi32> to vector<8x256xi32>
    %27 = arith.cmpi eq, %1, %26 : vector<8x256xi32>
    %28 = arith.ori %24, %27 : vector<8x256xi1>
    %29 = vector.extract_strided_slice %0 {offsets = [0, 7], sizes = [8, 1], strides = [1, 1]} : vector<8x9xi32> to vector<8x1xi32>
    %30 = vector.broadcast %29 : vector<8x1xi32> to vector<8x256xi32>
    %31 = arith.cmpi eq, %1, %30 : vector<8x256xi32>
    %32 = arith.ori %28, %31 : vector<8x256xi1>
    %33 = vector.extract_strided_slice %0 {offsets = [0, 8], sizes = [8, 1], strides = [1, 1]} : vector<8x9xi32> to vector<8x1xi32>
    %34 = vector.broadcast %33 : vector<8x1xi32> to vector<8x256xi32>
    %35 = arith.cmpi eq, %1, %34 : vector<8x256xi32>
    %36 = arith.ori %32, %35 : vector<8x256xi1>
    %37 = arith.extui %36 : vector<8x256xi1> to vector<8x256xi32>
    %38 = arith.sitofp %37 : vector<8x256xi32> to vector<8x256xf32>
    %39 = arith.truncf %38 : vector<8x256xf32> to vector<8x256xbf16>
    %c0_1 = arith.constant 0 : index
    %c0_2 = arith.constant 0 : index
    %40 = vector.load %arg2[%c0_1, %c0_2] : memref<256x128xbf16, #tpu.memory_space<vmem>>, vector<256x128xbf16>
    %cst = arith.constant dense<0.000000e+00> : vector<8x128xf32>
    %41 = tpu.matmul %39, %40, %cst {dimension_numbers = #tpu.dot_dimension_numbers<[1], [0], [0], [1], [0, 0, 1, 1], [], []>} : vector<8x256xbf16>, vector<256x128xbf16>, vector<8x128xf32> -> vector<8x128xf32>
    %c0_3 = arith.constant 0 : index
    %c0_4 = arith.constant 0 : index
    %42 = vector.load %arg3[%c0_3, %c0_4] : memref<8x128xf32, #tpu.memory_space<vmem>>, vector<8x128xf32>
    tpu.vector_store %arg3[%c0_3, %c0_4], %41 {strides = array<i32>} : memref<8x128xf32, #tpu.memory_space<vmem>>, vector<8x128xf32>,
    return
  }
  func.func @transform_0(%arg0: i32) -> (i32, i32) {
    %c0_i32 = arith.constant 0 : i32
    %c0_i32_0 = arith.constant 0 : i32
    return %arg0, %c0_i32 : i32, i32
  }
  func.func @transform_1(%arg0: i32) -> (i32, i32) {
    %c0_i32 = arith.constant 0 : i32
    %c0_i32_0 = arith.constant 0 : i32
    %c0_i32_1 = arith.constant 0 : i32
    return %c0_i32, %c0_i32_0 : i32, i32
  }
  func.func @transform_2(%arg0: i32) -> (i32, i32) {
    %c0_i32 = arith.constant 0 : i32
    %c0_i32_0 = arith.constant 0 : i32
    return %arg0, %c0_i32 : i32, i32
  }
}

</mosaic_0001>

<bundles_post_ra>
// kernel: tpu_custom_call.1
= control target key start
LH: loop header
LB: loop body
LE: loop exit
PB: predicated region body
PF: predicated region fallthrough
CT: control target
= control target key end

     0   :  { %7 = vsyncpa [#allocation3], 0  ;;  %s974_s0 = inlined_call_operand.hbm [shape: s32[16,9], index: 0, kind: input, shape index: {}]   ;;  %s975_s1 = inlined_call_operand.hbm [shape: bf16[256,128], index: 1, kind: input, shape index: {}]   ;;  %s976_s2 = inlined_call_operand.hbm [shape: f32[16,128], index: 2, kind: output, shape index: {}]  }
   0x1   :  { %9 = vsyncpa [#allocation3 + $0x1], 0 }
   0x2   :  { %10 = vsyncpa [#allocation6], 0 }
   0x3   :  { %11 = vsyncpa [#allocation4], 0 }
   0x4   :  { %13 = vsyncpa [#allocation4 + $0x1], 0  ;;  %s834_s9 = smov 0   ;;  %s836_s10 = smov 0  }
   0x5   :  { %s838_s11 = smov 0   ;;  %s840_s12 = smov 0  }
   0x6 LB: > { %s108_s15 = sshll.u32 %s975_s1, 4  ;;  %s858_s16 = sadd.s32 4294967295, %s804_s12   ;;  %s804_s12 = sphi %s840_s12, %s986_s12   ;;  %s800_s11 = sphi %s838_s11, %s985_s11   ;;  %s796_s10 = sphi %s836_s10, %s984_s10   ;;  %s792_s9 = sphi %s834_s9, %s983_s9   ;;  %s109_s15 = int_to_ptr.hbm [resolvable:$true] %s108_s15 }
   0x7   : > { %p501_p0 = scmp.ge.s32.totalorder %s804_s12, 1  ;;  %p40_p1 = scmp.eq.s32.totalorder %s858_s16, 0 }
   0x8   : > { %p97_p2 = scmp.lt.s32.totalorder %s804_s12, 3  ;;  %s806_s18 = smov [#allocation5]  }
   0x9   : > { %s110_s19 = sshll.u32 %s806_s18, 4  ;;  %s807_s20 = smov 64   ;;  %s111_s19 = int_to_ptr.vmem [resolvable:$true] %s110_s19 }
   0xa   : > { %p863_p3 = pnand %p501_p0, %p97_p2  ;;  %s808_s21 = smov 4  }
   0xb   : > { %s500_s22 = sadd.s32 4294967294, %s804_s12   ;;  %s874_s23 = sadd.s32 1, %s804_s12  }
   0xc   : > { %p604_p4 = pneg %p863_p3  ;;  %s26_s24 = sadd.s32 1, %s800_s11 }
   0xd   : > { %s23_s25 = ssub.s32 %s804_s12, %s874_s23  ;;  %p33_p7 = scmp.ne.s32.totalorder %s800_s11, %s796_s10 }
   0xe   : > { %p605_p6 = pnand %p604_p4, %p40_p1  ;;  %p24_p8 = scmp.eq.s32.totalorder %s23_s25, 0 }
   0xf   : > { %p34_p9 = scmp.eq.s32.totalorder %s804_s12, 0  ;;  %p39_p10 = scmp.ne.s32.totalorder %s796_s10, %s792_s9 }
  0x10   : > { %607 = dma.hbm_to_vmem [thread:$0]  (!%p605_p6), %s109_s15, 2048, %s111_s19, [#allocation6], %s807_s20, %s807_s20, %s808_s21  }
  0x11   : > { %p84_p11 = scmp.eq.s32.totalorder %s858_s16, 1  ;;  %p890_p12 = por %p40_p1, %p39_p10 }
  0x12   : > { %s886_s26 = scalar_select %p24_p8, %s800_s11, %s26_s24  }
  0x13   : > { %p894_p13 = por %p84_p11, %p33_p7  ;;  %p90_p0 = scmp.eq.s32.totalorder %s500_s22, 1 }
  0x14   : > { %p35_p2 = por %p34_p9, %p33_p7  ;;  %s124_s29 = sand.u32 1, %s800_s11  }
  0x15   : > { %p899_p4 = por %p90_p0, %p39_p10  ;;  %p617_p6 = scmp.lt.s32.totalorder %s804_s12, 2 }
  0x16   : > { %s504_s3 = sshll.u32 %s124_s29, 3  ;;  %s505_s4 = sshll.u32 %s804_s12, 3 }
  0x17   : > { %s132_s7 = scalar_lea.hbm %s974_s0, %s505_s4  ;;  %s128_s13 = scalar_lea.vmem [#allocation2], %s504_s3 }
  0x18   : > { %s134_s8 = sshll.u32 %s132_s7, 4  ;;  %s136_s14 = sshll.u32 %s128_s13, 4  ;;  %s135_s8 = int_to_ptr.hbm [resolvable:$true] %s134_s8  ;;  %s137_s14 = int_to_ptr.vmem [resolvable:$true] %s136_s14 }
  0x19   : > { %p908_p8 = pnand %p617_p6, %p35_p2  ;;  %s125_s18 = scalar_lea.sflag [#allocation3], %s124_s29 }
  0x1a   : > { %s704_s19 = sshra.s32 %s135_s8, 4  ;;  %s711_s24 = scalar_lea.hbm %s974_s0, 16  ;;  %s705_s19 = int_to_ptr.hbm [resolvable:$true] %s704_s19 }
  0x1b   : > { %s706_s20 = scalar_lea.hbm %s705_s19, 8  ;;  %p708_p9 = pneg %p908_p8 }
  0x1c   : > { %p707_p7 = scmp.ne.s32.totalorder %s705_s19, %s706_s20  ;;  %p712_p0 = scmp.lt.s32.totalorder %s705_s19, %s974_s0 }
  0x1d   : > { %p713_p2 = scmp.lt.s32.totalorder %s711_s24, %s706_s20 }
  0x1e   : > { %p709_p10 = pnand %p708_p9, %p707_p7 }
  0x1f   : > { %p714_p6 = por %p713_p2, %p712_p0 }
  0x20   : > { %p710_p11 = pneg %p709_p10 }
  0x22   : > { %p715_p5 = pnand %p714_p6, %p710_p11 }
  0x24   : > { %718 = shalt.err (!%p715_p5)
}
  0x25   : > { %611 = dma.hbm_to_vmem [thread:$0]  (!%p908_p8), %s135_s8, 128, %s137_s14, %s125_s18  }
  0x26   : > { %145 = sbr.rel (%p863_p3) target bundleno = 327 (0x147), region = 28  ;;  %s925_s29 = sand.u32 (!%p863_p3), 1, %s796_s10  }
  0x27   : > { %s507_s4 = sshll.u32 (!%p863_p3), %s925_s29, 3  ;;  %s148_s5 = scalar_lea.sflag (!%p863_p3), [#allocation3], %s925_s29 }
  0x28   : > { %s151_s6 = scalar_lea.vmem (!%p863_p3), [#allocation2], %s507_s4 }
  0x2b   : > { %779 = dma.done.wait (%p890_p12), %s148_s5, 128  }
  0x2c   : > { %781 = vsyncadd (%p890_p12), %s148_s5, 4294967168 }
  0x2d   : > { %783 = dma.done.wait (%p40_p1), [#allocation6], 2048  }
  0x2e   : > { %785 = vsyncadd (%p40_p1), [#allocation6], 4294965248  ;;  %v809_v0 = vmov 2   ;;  %v810_v1 = vmov 0   ;;  %v811_v2 = vmov 4   ;;  %v178_v3 = vld [vmem:[%s151_s6] sm:$0xff]  ;;  %v179_v27 = vlaneseq }
  0x2f   : > { %667 = vset.pattern.permute.xlu1 %v809_v0  ;;  %665 = vset.pattern.permute.xlu0 %v810_v1  ;;  %v587_v4 = vld [vmem:[#allocation5 + $0x38] sm:$0xff]  ;;  %v586_v6 = vld [vmem:[#allocation5 + $0x30] sm:$0xff]  ;;  %v812_v8 = vmov 3   ;;  %v813_v9 = vmov 1   ;;  %v814_v10 = vmov 5   ;;  %v815_v11 = vmov 6  }
  0x30   : > { %669 = vset.pattern.permute.xlu2 %v811_v2  ;;  %v595_v5 = vld [vmem:[#allocation5 + $0x78] sm:$0xff]  ;;  %195 = vperm.xlu1 %667, %v178_v3   ;;  %v594_v7 = vld [vmem:[#allocation5 + $0x70] sm:$0xff]  ;;  %v816_v12 = vmov 8   ;;  %v817_v13 = vmov 7   ;;  %v585_v14 = vld [vmem:[#allocation5 + $0x28] sm:$0xff]  ;;  %v180_v30 = vand.u32 127, %v179_v27 }
  0x31   : > { %183 = vperm.xlu0 %665, %v178_v3   ;;  %209 = vperm.xlu2 %669, %v178_v3   ;;  %v593_v15 = vld [vmem:[#allocation5 + $0x68] sm:$0xff]  ;;  %v584_v16 = vld [vmem:[#allocation5 + $0x20] sm:$0xff]  ;;  %v583_v18 = vld [vmem:[#allocation5 + $0x18] sm:$0xff]  ;;  %v818_v38 = vmov 0.0   ;;  %s577_s17 = sshll.u32 %s858_s16, 3  ;;  %s177_s13 = scalar_lea.vmem [#allocation7], %s507_s4 }
  0x32   : > { %377 = vmatpush.bf16.msra.mxu0 %v587_v4  ;;  %390 = vmatpush.bf16.msra.mxu1 %v595_v5  ;;  %v592_v17 = vld [vmem:[#allocation5 + $0x60] sm:$0xff]  ;;  %v591_v19 = vld [vmem:[#allocation5 + $0x58] sm:$0xff]  ;;  %v582_v20 = vld [vmem:[#allocation5 + $0x10] sm:$0xff]  ;;  %v181_v32 = vadd.s32 128, %v180_v30  ;;  %s415_s8 = scalar_lea.hbm %s976_s2, %s577_s17  ;;  %s417_s14 = sshll.u32 %s177_s13, 4  ;;  %s418_s14 = int_to_ptr.vmem [resolvable:$true] %s417_s14 }
  0x33   : > { %v590_v21 = vld [vmem:[#allocation5 + $0x50] sm:$0xff]  ;;  %v581_v22 = vld [vmem:[#allocation5 + $0x8] sm:$0xff]  ;;  %v580_v24 = vld [vmem:[#allocation5] sm:$0xff]  ;;  %s419_s15 = sshll.u32 %s415_s8, 4  ;;  %s405_s18 = scalar_lea.sflag [#allocation4], %s925_s29  ;;  %s420_s15 = int_to_ptr.hbm [resolvable:$true] %s419_s15 }
  0x34   : > { %v589_v23 = vld [vmem:[#allocation5 + $0x48] sm:$0xff]  ;;  %v588_v25 = vld [vmem:[#allocation5 + $0x40] sm:$0xff]  ;;  %s748_s19 = sshra.s32 %s420_s15, 4  ;;  %s754_s22 = scalar_lea.hbm %s976_s2, 16  ;;  %s749_s19 = int_to_ptr.hbm [resolvable:$true] %s748_s19 }
  0x35   : > { %s750_s20 = scalar_lea.hbm %s749_s19, 8  ;;  %p755_p12 = scmp.lt.s32.totalorder %s749_s19, %s976_s2 }
  0x36   : > { %378 = vmatpush.bf16.msra.mxu0 %v586_v6  ;;  %391 = vmatpush.bf16.msra.mxu1 %v594_v7  ;;  %p751_p1 = scmp.ne.s32.totalorder %s749_s19, %s750_s20  ;;  %p756_p8 = scmp.lt.s32.totalorder %s754_s22, %s750_s20 }
  0x38   : > { %668 = vset.pattern.permute.xlu1 %v812_v8  ;;  %p752_p3 = pnand %p751_p1, %p894_p13  ;;  %p757_p7 = por %p756_p8, %p755_p12 }
  0x39   : > { %666 = vset.pattern.permute.xlu0 %v813_v9  ;;  %202 = vperm.xlu1 %668, %v178_v3  }
  0x3a   : > { %188 = vperm.xlu0 %666, %v178_v3   ;;  %670 = vset.pattern.permute.xlu2 %v814_v10  ;;  %p753_p5 = pneg %p752_p3 }
  0x3b   : > { %216 = vperm.xlu2 %670, %v178_v3   ;;  %379 = vmatpush.bf16.msra.mxu0 %v585_v14 }
  0x3c   : > { %392 = vmatpush.bf16.msra.mxu1 %v593_v15  ;;  %p758_p9 = pnand %p757_p7, %p753_p5 }
  0x3f   : > { %380 = vmatpush.bf16.msra.mxu0 %v584_v16 }
  0x40   : > { %393 = vmatpush.bf16.msra.mxu1 %v592_v17 }
  0x41   : > { %671 = vset.pattern.permute.xlu1 %v815_v11 }
  0x42   : > { %673 = vset.pattern.permute.xlu0 %v816_v12  ;;  %223 = vperm.xlu1 %671, %v178_v3  }
  0x43   : > { %237 = vperm.xlu0 %673, %v178_v3   ;;  %672 = vset.pattern.permute.xlu2 %v817_v13 }
  0x44   : > { %230 = vperm.xlu2 %672, %v178_v3   ;;  %381 = vmatpush.bf16.msra.mxu0 %v583_v18 }
  0x45   : > { %394 = vmatpush.bf16.msra.mxu1 %v591_v19 }
  0x48   : > { %382 = vmatpush.bf16.msra.mxu0 %v582_v20 }
  0x49   : > { %395 = vmatpush.bf16.msra.mxu1 %v590_v21 }
  0x4c   : > { %383 = vmatpush.bf16.msra.mxu0 %v581_v22 }
  0x4d   : > { %396 = vmatpush.bf16.msra.mxu1 %v589_v23 }
  0x50   : > { %384 = vmatpush.bf16.msra.mxu0 %v580_v24 }
  0x51   : > { %397 = vmatpush.bf16.msra.mxu1 %v588_v25 }
  0x8b   : > { %v210_v26 = vpop.permute.xlu2 %209 }
  0x8c   : > { %vm211_vm13 = vcmp.eq.s32.totalorder %v180_v30, %v210_v26  ;;  %vm212_vm15 = vcmp.eq.s32.totalorder %v181_v32, %v210_v26 }
  0x95   : > { %v217_v31 = vpop.permute.xlu2 %216 }
  0x9e   : > { %v231_v35 = vpop.permute.xlu2 %230 }
  0xa2   : > { %v196_v28 = vpop.permute.xlu1 %195 }
  0xa3   : > { %v184_v29 = vpop.permute.xlu0 %183  ;;  %vm197_vm5 = vcmp.eq.s32.totalorder %v180_v30, %v196_v28  ;;  %vm198_vm7 = vcmp.eq.s32.totalorder %v181_v32, %v196_v28 }
  0xa4   : > { %vm185_vm0 = vcmp.eq.s32.totalorder %v180_v30, %v184_v29  ;;  %vm186_vm3 = vcmp.eq.s32.totalorder %v181_v32, %v184_v29 }
  0xab   : > { %v203_v33 = vpop.permute.xlu1 %202 }
  0xac   : > { %v189_v34 = vpop.permute.xlu0 %188  ;;  %vm204_vm9 = vcmp.eq.s32.totalorder %v180_v30, %v203_v33  ;;  %vm205_vm11 = vcmp.eq.s32.totalorder %v181_v32, %v203_v33 }
  0xad   : > { %vm190_vm1 = vcmp.eq.s32.totalorder %v180_v30, %v189_v34  ;;  %vm191_vm2 = vcmp.eq.s32.totalorder %v181_v32, %v189_v34 }
  0xae   : > { %vm192_vm4 = vmor %vm185_vm0, %vm190_vm1  ;;  %vm218_vm1 = vcmp.eq.s32.totalorder %v180_v30, %v217_v31 }
  0xaf   : > { %vm193_vm6 = vmor %vm186_vm3, %vm191_vm2  ;;  %vm219_vm3 = vcmp.eq.s32.totalorder %v181_v32, %v217_v31 }
  0xb0   : > { %vm199_vm8 = vmor %vm192_vm4, %vm197_vm5 }
  0xb1   : > { %vm200_vm10 = vmor %vm193_vm6, %vm198_vm7 }
  0xb2   : > { %vm206_vm12 = vmor %vm199_vm8, %vm204_vm9  ;;  %vm232_vm8 = vcmp.eq.s32.totalorder %v180_v30, %v231_v35 }
  0xb3   : > { %vm207_vm14 = vmor %vm200_vm10, %vm205_vm11  ;;  %vm233_vm10 = vcmp.eq.s32.totalorder %v181_v32, %v231_v35 }
  0xb4   : > { %vm213_vm0 = vmor %vm206_vm12, %vm211_vm13  ;;  %v224_v36 = vpop.permute.xlu1 %223 }
  0xb5   : > { %vm214_vm2 = vmor %vm207_vm14, %vm212_vm15  ;;  %vm225_vm5 = vcmp.eq.s32.totalorder %v180_v30, %v224_v36  ;;  %vm226_vm6 = vcmp.eq.s32.totalorder %v181_v32, %v224_v36  ;;  %v238_v37 = vpop.permute.xlu0 %237 }
  0xb6   : > { %vm220_vm4 = vmor %vm213_vm0, %vm218_vm1  ;;  %vm239_vm12 = vcmp.eq.s32.totalorder %v180_v30, %v238_v37  ;;  %vm240_vm14 = vcmp.eq.s32.totalorder %v181_v32, %v238_v37 }
  0xb7   : > { %vm221_vm7 = vmor %vm214_vm2, %vm219_vm3 }
  0xb8   : > { %vm227_vm9 = vmor %vm220_vm4, %vm225_vm5 }
  0xb9   : > { %vm228_vm11 = vmor %vm221_vm7, %vm226_vm6 }
  0xba   : > { %vm234_vm13 = vmor %vm227_vm9, %vm232_vm8 }
  0xbb   : > { %vm235_vm15 = vmor %vm228_vm11, %vm233_vm10 }
  0xbc   : > { %vm241_vm0 = vmor %vm234_vm13, %vm239_vm12 }
  0xbd   : > { %vm242_vm1 = vmor %vm235_vm15, %vm240_vm14  ;;  %v510_v39 = vsel %vm241_vm0, 1.0, %v818_v38 }
  0xbe   : > { %v247_v40 = vpack.c.bf16 %v510_v39, %v510_v39  ;;  %v511_v41 = vsel %vm242_vm1, 1.0, %v818_v38 }
  0xbf   : > { %v248_v42 = vpack.c.bf16 %v511_v41, %v511_v41 }
  0xc0   : > { %385 = vmatmul.bf16.vlgmr.msra.gmra.mxu0 %v247_v40 }
  0xc1   : > { %398 = vmatmul.bf16.vlgmr.msra.gmra.mxu1 %v248_v42 }
 0x13d   : > { %v386_v43 = vpop.f32.mrf.mxu0 }
 0x13e   : > { %v399_v44 = vpop.f32.mrf.mxu1 }
 0x13f   : > { %v400_v45 = vadd.f32 %v399_v44, %v386_v43 }
 0x141   : > { %403 = vst [vmem:[%s177_s13] sm:$0xff] %v400_v45 }
 0x142   : > { %761 = shalt.err (!%p758_p9)
}
 0x143   : > { %602 = dma.vmem_to_hbm [thread:$0]  (%p894_p13), %s418_s14, 128, %s420_s15, %s405_s18  }
 0x145   : > { %v388_v46 = vpop.f32.mrf.mxu0 }
 0x146   : > { %v401_v47 = vpop.f32.mrf.mxu1 }
 0x147 PF: > { %s431_s3 = sand.u32 1, %s792_s9   ;;  %p982_p10 = scmp.ge.s32.totalorder %s804_s12, 2 }
 0x148   : > { %s432_s29 = scalar_lea.sflag [#allocation4], %s431_s3 }
 0x149   : > { %p613_p11 = pnand %p982_p10, %p899_p4 }
 0x14b   : > { %p614_p0 = pneg %p613_p11 }
 0x14d   : > { %787 = dma.done.wait (%p614_p0), %s432_s29, 128  }
 0x14e   : > { %789 = vsyncadd (%p614_p0), %s432_s29, 4294967168  ;;  %p16_p13 = scmp.ge.s32.totalorder %s874_s23, 4   ;;  %s983_s9 = smov %s796_s10 }
 0x14f   : > { %s984_s10 = smov %s800_s11  ;;  %s985_s11 = smov %s886_s26 }
 0x150   : > { %s986_s12 = smov %s874_s23  ;;  %18 = sbr.rel (!%p16_p13) target bundleno = 6 (0x6), region = 77 }
 0x155   :  { %438 = vsyncpa [#allocation3], 1 }
 0x156   :  { %440 = vsyncpa [#allocation3 + $0x1], 1 }
 0x157   :  { %441 = vsyncpa [#allocation6], 1 }
 0x158   :  { %442 = vsyncpa [#allocation4], 1 }
 0x159   :  { %444 = vsyncpa [#allocation4 + $0x1], 1 }

</bundles_post_ra>
